<compile_context>
chip_gen: v7x
topology: tpu7x:2x2x1
jax: 0.10.0
libtpu: 0.0.40
codegen_flags: <defaults>
</compile_context>

<pallas_src>
import functools

import jax
import jax.numpy as jnp
from jax.experimental import pallas as pl
from jax.experimental.pallas import tpu as pltpu

HIDDEN = 256   # l1/l2 hidden width (matches nn.Linear(.., 256))
K_PAD = 128    # lane-friendly padded state_dim for the first matmul
A_PAD = 128    # lane-dense padded action_dim for unmasked output stores


def _round_up(x, m):
    return (x + m - 1) // m * m


def actor_kernel(x_ref, w1_ref, b1_ref, w2_ref, b2_ref, w3_ref, b3_ref, out_ref):
    # x: (TB, K_PAD) f32; weights bf16; biases f32.
    # Only the matmul operands are bf16 (MXU-native); all elementwise work
    # (bias add, ReLU) is f32, and MXU accumulation is forced to f32.
    x = x_ref[...].astype(jnp.bfloat16)

    h1 = jnp.dot(x, w1_ref[...], preferred_element_type=jnp.float32) + b1_ref[...]
    h1 = jnp.maximum(h1, 0.0)

    h2 = jnp.dot(h1.astype(jnp.bfloat16), w2_ref[...],
                 preferred_element_type=jnp.float32) + b2_ref[...]
    h2 = jnp.maximum(h2, 0.0)

    y = jnp.dot(h2.astype(jnp.bfloat16), w3_ref[...],
                preferred_element_type=jnp.float32) + b3_ref[...]
    out_ref[...] = y.astype(out_ref.dtype)


@functools.partial(jax.jit, static_argnames=("block_b",))
def actor_forward(state, params, *, block_b=256):
    """Forward pass. `state`: (B, state_dim) f32. `params`: raw f32 params."""
    w1, b1, w2, b2, w3, b3 = params
    B, state_dim = state.shape
    action_dim = w3.shape[1]
    assert state_dim <= K_PAD and action_dim <= A_PAD and w1.shape[1] == HIDDEN

    # Batch tile: at least 8 rows (sublane multiple), at most `block_b` rows.
    tb = min(block_b, _round_up(B, 8))
    b_pad = _round_up(B, tb)

    # ---- wrapper-side shape plumbing (zero pad + bf16 cast; folded by XLA) ----
    x = jnp.zeros((b_pad, K_PAD), jnp.float32).at[:B, :state_dim].set(
        state.astype(jnp.float32))
    w1p = (jnp.zeros((K_PAD, HIDDEN), jnp.float32)
           .at[:state_dim, :].set(w1)).astype(jnp.bfloat16)
    w2p = w2.astype(jnp.bfloat16)
    w3p = (jnp.zeros((HIDDEN, A_PAD), jnp.float32)
           .at[:, :action_dim].set(w3)).astype(jnp.bfloat16)
    b1p = b1.reshape(1, HIDDEN).astype(jnp.float32)
    b2p = b2.reshape(1, HIDDEN).astype(jnp.float32)
    b3p = jnp.zeros((1, A_PAD), jnp.float32).at[:, :action_dim].set(
        b3.reshape(1, action_dim))

    grid = (b_pad // tb,)
    flops = 2 * b_pad * (K_PAD * HIDDEN + HIDDEN * HIDDEN + HIDDEN * A_PAD)
    bytes_accessed = (x.size * 4 + b_pad * A_PAD * 4              # activations in/out
                      + (w1p.size + w2p.size + w3p.size) * 2      # bf16 weights
                      + (b1p.size + b2p.size + b3p.size) * 4)     # f32 biases

    const = lambda i: (0, 0)   # weights/biases: VMEM-resident across the grid
    out = pl.pallas_call(
        actor_kernel,
        out_shape=jax.ShapeDtypeStruct((b_pad, A_PAD), jnp.float32),
        grid=grid,
        in_specs=[
            pl.BlockSpec((tb, K_PAD), lambda i: (i, 0)),    # state: streamed
            pl.BlockSpec((K_PAD, HIDDEN), const),
            pl.BlockSpec((1, HIDDEN), const),
            pl.BlockSpec((HIDDEN, HIDDEN), const),
            pl.BlockSpec((1, HIDDEN), const),
            pl.BlockSpec((HIDDEN, A_PAD), const),
            pl.BlockSpec((1, A_PAD), const),
        ],
        out_specs=pl.BlockSpec((tb, A_PAD), lambda i: (i, 0)),
        compiler_params=pltpu.CompilerParams(
            dimension_semantics=("parallel",)),
        cost_estimate=pl.CostEstimate(
            flops=flops, transcendentals=0, bytes_accessed=bytes_accessed),
    )(x, w1p, b1p, w2p, b2p, w3p, b3p)

    # Slice the lane-dense padded output back to the real shape (done by XLA).
    return out[:B, :action_dim]


def init_actor_params(key, state_dim, action_dim, hidden=HIDDEN):
    # Deterministic init mimicking PyTorch nn.Linear default:
    # U(-1/sqrt(fan_in), 1/sqrt(fan_in)) for both weight and bias.
    # Weights stored as [in_features, out_features] (transpose of PyTorch).
    def linear(k, fan_in, fan_out):
        kw, kb = jax.random.split(k)
        bound = 1.0 / jnp.sqrt(jnp.float32(fan_in))
        w = jax.random.uniform(kw, (fan_in, fan_out), jnp.float32, -bound, bound)
        b = jax.random.uniform(kb, (1, fan_out), jnp.float32, -bound, bound)
        return w, b

    k1, k2, k3 = jax.random.split(key, 3)
    w1, b1 = linear(k1, state_dim, hidden)
    w2, b2 = linear(k2, hidden, hidden)
    w3, b3 = linear(k3, hidden, action_dim)
    return (w1, b1, w2, b2, w3, b3)


def actor_forward_ref(state, params):
    # Pure-JAX f32 reference with identical semantics to the PyTorch module.
    w1, b1, w2, b2, w3, b3 = params
    h1 = jnp.maximum(state @ w1 + b1.reshape(1, -1), 0.0)
    h2 = jnp.maximum(h1 @ w2 + b2.reshape(1, -1), 0.0)
    return h2 @ w3 + b3.reshape(1, -1)


if __name__ == "__main__":
    key = jax.random.PRNGKey(0)
    k_state, k_state2, k_params = jax.random.split(key, 3)

    state_dim = 16
    action_dim = 6
    params = init_actor_params(k_params, state_dim, action_dim)

    # Small batch (single grid step).
    batch = 8
    state = jax.random.normal(k_state, (batch, state_dim), jnp.float32)
    out = jax.block_until_ready(actor_forward(state, params))
    ref = actor_forward_ref(state, params)
    assert out.shape == (batch, action_dim)
    assert jnp.allclose(out, ref, atol=2e-2, rtol=2e-2)

    # Larger, non-multiple batch: exercises the batch grid + padding path.
    batch2 = 300
    state2 = jax.random.normal(k_state2, (batch2, state_dim), jnp.float32)
    out2 = jax.block_until_ready(actor_forward(state2, params))
    ref2 = actor_forward_ref(state2, params)
    assert out2.shape == (batch2, action_dim)
    assert jnp.allclose(out2, ref2, atol=2e-2, rtol=2e-2)

    print("KERNEL_OK")
</pallas_src>

<mosaic_0001>
module attributes {stable_mosaic.version = 11 : i64} {
  func.func @actor_kernel(%arg0: i32, %arg1: memref<8x128xf32, #tpu.memory_space<vmem>>, %arg2: memref<128x256xbf16, #tpu.memory_space<vmem>>, %arg3: memref<1x256xf32, #tpu.memory_space<vmem>>, %arg4: memref<256x256xbf16, #tpu.memory_space<vmem>>, %arg5: memref<1x256xf32, #tpu.memory_space<vmem>>, %arg6: memref<256x128xbf16, #tpu.memory_space<vmem>>, %arg7: memref<1x128xf32, #tpu.memory_space<vmem>>, %arg8: memref<8x128xf32, #tpu.memory_space<vmem>>) attributes {dimension_semantics = [#tpu.dimension_semantics<parallel>], iteration_bounds = array<i64: 1>, scalar_prefetch = 0 : i64, scratch_operands = 0 : i64, tpu.core_type = #tpu.core_type<tc>, window_params = [{transform_indices = @transform_0, window_bounds = array<i64: 8, 128>}, {pipeline_mode = #tpu.pipeline_mode<synchronous>, transform_indices = @transform_1, window_bounds = array<i64: 128, 256>}, {pipeline_mode = #tpu.pipeline_mode<synchronous>, transform_indices = @transform_2, window_bounds = array<i64: 1, 256>}, {pipeline_mode = #tpu.pipeline_mode<synchronous>, transform_indices = @transform_3, window_bounds = array<i64: 256, 256>}, {pipeline_mode = #tpu.pipeline_mode<synchronous>, transform_indices = @transform_4, window_bounds = array<i64: 1, 256>}, {pipeline_mode = #tpu.pipeline_mode<synchronous>, transform_indices = @transform_5, window_bounds = array<i64: 256, 128>}, {pipeline_mode = #tpu.pipeline_mode<synchronous>, transform_indices = @transform_6, window_bounds = array<i64: 1, 128>}, {transform_indices = @transform_7, window_bounds = array<i64: 8, 128>}]} {
    %c0 = arith.constant 0 : index
    %c0_0 = arith.constant 0 : index
    %0 = vector.load %arg1[%c0, %c0_0] : memref<8x128xf32, #tpu.memory_space<vmem>>, vector<8x128xf32>
    %1 = arith.truncf %0 : vector<8x128xf32> to vector<8x128xbf16>
    %c0_1 = arith.constant 0 : index
    %c0_2 = arith.constant 0 : index
    %2 = vector.load %arg2[%c0_1, %c0_2] : memref<128x256xbf16, #tpu.memory_space<vmem>>, vector<128x256xbf16>
    %cst = arith.constant dense<0.000000e+00> : vector<8x256xf32>
    %3 = tpu.matmul %1, %2, %cst {dimension_numbers = #tpu.dot_dimension_numbers<[1], [0], [0], [1], [0, 0, 1, 1], [], []>} : vector<8x128xbf16>, vector<128x256xbf16>, vector<8x256xf32> -> vector<8x256xf32>
    %c0_3 = arith.constant 0 : index
    %c0_4 = arith.constant 0 : index
    %4 = vector.load %arg3[%c0_3, %c0_4] : memref<1x256xf32, #tpu.memory_space<vmem>>, vector<1x256xf32>
    %5 = vector.broadcast %4 : vector<1x256xf32> to vector<8x256xf32>
    %6 = arith.addf %3, %5 : vector<8x256xf32>
    %cst_5 = arith.constant 0.000000e+00 : f32
    %7 = vector.broadcast %cst_5 : f32 to vector<8x256xf32>
    %8 = arith.maximumf %6, %7 : vector<8x256xf32>
    %9 = arith.truncf %8 : vector<8x256xf32> to vector<8x256xbf16>
    %c0_6 = arith.constant 0 : index
    %c0_7 = arith.constant 0 : index
    %10 = vector.load %arg4[%c0_6, %c0_7] : memref<256x256xbf16, #tpu.memory_space<vmem>>, vector<256x256xbf16>
    %cst_8 = arith.constant dense<0.000000e+00> : vector<8x256xf32>
    %11 = tpu.matmul %9, %10, %cst_8 {dimension_numbers = #tpu.dot_dimension_numbers<[1], [0], [0], [1], [0, 0, 1, 1], [], []>} : vector<8x256xbf16>, vector<256x256xbf16>, vector<8x256xf32> -> vector<8x256xf32>
    %c0_9 = arith.constant 0 : index
    %c0_10 = arith.constant 0 : index
    %12 = vector.load %arg5[%c0_9, %c0_10] : memref<1x256xf32, #tpu.memory_space<vmem>>, vector<1x256xf32>
    %13 = vector.broadcast %12 : vector<1x256xf32> to vector<8x256xf32>
    %14 = arith.addf %11, %13 : vector<8x256xf32>
    %cst_11 = arith.constant 0.000000e+00 : f32
    %15 = vector.broadcast %cst_11 : f32 to vector<8x256xf32>
    %16 = arith.maximumf %14, %15 : vector<8x256xf32>
    %17 = arith.truncf %16 : vector<8x256xf32> to vector<8x256xbf16>
    %c0_12 = arith.constant 0 : index
    %c0_13 = arith.constant 0 : index
    %18 = vector.load %arg6[%c0_12, %c0_13] : memref<256x128xbf16, #tpu.memory_space<vmem>>, vector<256x128xbf16>
    %cst_14 = arith.constant dense<0.000000e+00> : vector<8x128xf32>
    %19 = tpu.matmul %17, %18, %cst_14 {dimension_numbers = #tpu.dot_dimension_numbers<[1], [0], [0], [1], [0, 0, 1, 1], [], []>} : vector<8x256xbf16>, vector<256x128xbf16>, vector<8x128xf32> -> vector<8x128xf32>
    %c0_15 = arith.constant 0 : index
    %c0_16 = arith.constant 0 : index
    %20 = vector.load %arg7[%c0_15, %c0_16] : memref<1x128xf32, #tpu.memory_space<vmem>>, vector<1x128xf32>
    %21 = vector.broadcast %20 : vector<1x128xf32> to vector<8x128xf32>
    %22 = arith.addf %19, %21 : vector<8x128xf32>
    %c0_17 = arith.constant 0 : index
    %c0_18 = arith.constant 0 : index
    %23 = vector.load %arg8[%c0_17, %c0_18] : memref<8x128xf32, #tpu.memory_space<vmem>>, vector<8x128xf32>
    tpu.vector_store %arg8[%c0_17, %c0_18], %22 {strides = array<i32>} : memref<8x128xf32, #tpu.memory_space<vmem>>, vector<8x128xf32>,
    return
  }
  func.func @transform_0(%arg0: i32) -> (i32, i32) {
    %c0_i32 = arith.constant 0 : i32
    %c0_i32_0 = arith.constant 0 : i32
    return %arg0, %c0_i32 : i32, i32
  }
  func.func @transform_1(%arg0: i32) -> (i32, i32) {
    %c0_i32 = arith.constant 0 : i32
    %c0_i32_0 = arith.constant 0 : i32
    %c0_i32_1 = arith.constant 0 : i32
    return %c0_i32, %c0_i32_0 : i32, i32
  }
  func.func @transform_2(%arg0: i32) -> (i32, i32) {
    %c0_i32 = arith.constant 0 : i32
    %c0_i32_0 = arith.constant 0 : i32
    %c0_i32_1 = arith.constant 0 : i32
    return %c0_i32, %c0_i32_0 : i32, i32
  }
  func.func @transform_3(%arg0: i32) -> (i32, i32) {
    %c0_i32 = arith.constant 0 : i32
    %c0_i32_0 = arith.constant 0 : i32
    %c0_i32_1 = arith.constant 0 : i32
    return %c0_i32, %c0_i32_0 : i32, i32
  }
  func.func @transform_4(%arg0: i32) -> (i32, i32) {
    %c0_i32 = arith.constant 0 : i32
    %c0_i32_0 = arith.constant 0 : i32
    %c0_i32_1 = arith.constant 0 : i32
    return %c0_i32, %c0_i32_0 : i32, i32
  }
  func.func @transform_5(%arg0: i32) -> (i32, i32) {
    %c0_i32 = arith.constant 0 : i32
    %c0_i32_0 = arith.constant 0 : i32
    %c0_i32_1 = arith.constant 0 : i32
    return %c0_i32, %c0_i32_0 : i32, i32
  }
  func.func @transform_6(%arg0: i32) -> (i32, i32) {
    %c0_i32 = arith.constant 0 : i32
    %c0_i32_0 = arith.constant 0 : i32
    %c0_i32_1 = arith.constant 0 : i32
    return %c0_i32, %c0_i32_0 : i32, i32
  }
  func.func @transform_7(%arg0: i32) -> (i32, i32) {
    %c0_i32 = arith.constant 0 : i32
    %c0_i32_0 = arith.constant 0 : i32
    return %arg0, %c0_i32 : i32, i32
  }
}

</mosaic_0001>

<bundles_post_ra>
// kernel: actor_forward.1
= control target key start
LH: loop header
LB: loop body
LE: loop exit
PB: predicated region body
PF: predicated region fallthrough
CT: control target
= control target key end

     0   :  { %v823_v2 = vmov 0   ;;  %s1081_s0 = inlined_call_operand.vmem [shape: f32[8,128], index: 0, kind: input, shape index: {}]   ;;  %s1082_s1 = inlined_call_operand.vmem [shape: bf16[128,256], index: 1, kind: input, shape index: {}]   ;;  %s1083_s2 = inlined_call_operand.vmem [shape: f32[1,256], index: 2, kind: input, shape index: {}]   ;;  %s1084_s3 = inlined_call_operand.vmem [shape: bf16[256,256], index: 3, kind: input, shape index: {}]   ;;  %s1085_s4 = inlined_call_operand.vmem [shape: f32[1,256], index: 4, kind: input, shape index: {}]   ;;  %s1086_s5 = inlined_call_operand.vmem [shape: bf16[256,128], index: 5, kind: input, shape index: {}]   ;;  %s1087_s6 = inlined_call_operand.vmem [shape: f32[1,128], index: 6, kind: input, shape index: {}]   ;;  %s1088_s7 = inlined_call_operand.hbm [shape: f32[8,128], index: 7, kind: output, shape index: {}]  }
   0x1   :  { %v711_v0 = vld [vmem:[%s1082_s1 + $0x4] ss:$8 sps:$4 sm:$0xff]   ;;  %v713_v1 = vld [vmem:[%s1082_s1] ss:$8 sps:$4 sm:$0xff]   ;;  %170 = vmatprep.mubr.bf16.mxu0 %v823_v2  ;;  %v714_v3 = vld [vmem:[%s1082_s1 + $0x14] ss:$8 sps:$4 sm:$0xff]  }
   0x2   :  { %138 = vmatprep.subr.bf16.mxu0 %v711_v0  ;;  %v716_v4 = vld [vmem:[%s1082_s1 + $0x10] ss:$8 sps:$4 sm:$0xff]   ;;  %v717_v5 = vld [vmem:[%s1082_s1 + $0x24] ss:$8 sps:$4 sm:$0xff]   ;;  %v719_v6 = vld [vmem:[%s1082_s1 + $0x20] ss:$8 sps:$4 sm:$0xff]  }
   0x3   :  { %139 = vmatpush1.bf16.msra.mxu0 %v713_v1  ;;  %v720_v7 = vld [vmem:[%s1082_s1 + $0x34] ss:$8 sps:$4 sm:$0xff]   ;;  %v722_v8 = vld [vmem:[%s1082_s1 + $0x30] ss:$8 sps:$4 sm:$0xff]   ;;  %v723_v9 = vld [vmem:[%s1082_s1 + $0x44] ss:$8 sps:$4 sm:$0xff]  }
   0x4   :  { %140 = vmatprep.subr.bf16.mxu0 %v714_v3  ;;  %v735_v10 = vld [vmem:[%s1084_s3 + $0x4] ss:$8 sps:$4 sm:$0xff]   ;;  %v737_v11 = vld [vmem:[%s1084_s3] ss:$8 sps:$4 sm:$0xff]   ;;  %v738_v12 = vld [vmem:[%s1084_s3 + $0x14] ss:$8 sps:$4 sm:$0xff]  }
   0x5   :  { %387 = vmatprep.subr.bf16.mxu1 %v735_v10  ;;  %v725_v13 = vld [vmem:[%s1082_s1 + $0x40] ss:$8 sps:$4 sm:$0xff]   ;;  %v740_v14 = vld [vmem:[%s1084_s3 + $0x10] ss:$8 sps:$4 sm:$0xff]   ;;  %v741_v15 = vld [vmem:[%s1084_s3 + $0x24] ss:$8 sps:$4 sm:$0xff]  }
   0x6   :  { %388 = vmatpush1.bf16.msra.mxu1 %v737_v11  ;;  %v726_v16 = vld [vmem:[%s1082_s1 + $0x54] ss:$8 sps:$4 sm:$0xff]   ;;  %v728_v17 = vld [vmem:[%s1082_s1 + $0x50] ss:$8 sps:$4 sm:$0xff]   ;;  %v743_v18 = vld [vmem:[%s1084_s3 + $0x20] ss:$8 sps:$4 sm:$0xff]  }
   0x7   :  { %141 = vmatpush1.bf16.msra.mxu0 %v716_v4  ;;  %389 = vmatprep.subr.bf16.mxu1 %v738_v12  ;;  %v744_v19 = vld [vmem:[%s1084_s3 + $0x34] ss:$8 sps:$4 sm:$0xff]   ;;  %v729_v20 = vld [vmem:[%s1082_s1 + $0x64] ss:$8 sps:$4 sm:$0xff]   ;;  %v731_v21 = vld [vmem:[%s1082_s1 + $0x60] ss:$8 sps:$4 sm:$0xff]  }
   0x8   :  { %142 = vmatprep.subr.bf16.mxu0 %v717_v5  ;;  %v746_v22 = vld [vmem:[%s1084_s3 + $0x30] ss:$8 sps:$4 sm:$0xff]   ;;  %v747_v23 = vld [vmem:[%s1084_s3 + $0x44] ss:$8 sps:$4 sm:$0xff]   ;;  %v732_v24 = vld [vmem:[%s1082_s1 + $0x74] ss:$8 sps:$4 sm:$0xff]  }
   0x9   :  { %v734_v25 = vld [vmem:[%s1082_s1 + $0x70] ss:$8 sps:$4 sm:$0xff]   ;;  %v28_v26 = vld [vmem:[%s1081_s0] sm:$0xff]  ;;  %v750_v28 = vld [vmem:[%s1084_s3 + $0x54] ss:$8 sps:$4 sm:$0xff]  }
   0xa   :  { %390 = vmatpush1.bf16.msra.mxu1 %v740_v14  ;;  %v749_v27 = vld [vmem:[%s1084_s3 + $0x40] ss:$8 sps:$4 sm:$0xff]   ;;  %v752_v29 = vld [vmem:[%s1084_s3 + $0x50] ss:$8 sps:$4 sm:$0xff]   ;;  %v753_v30 = vld [vmem:[%s1084_s3 + $0x64] ss:$8 sps:$4 sm:$0xff]   ;;  %v29_v31 = vpack.c.bf16 %v28_v26, %v28_v26 }
   0xb   :  { %143 = vmatpush1.bf16.msra.mxu0 %v719_v6  ;;  %391 = vmatprep.subr.bf16.mxu1 %v741_v15  ;;  %v755_v32 = vld [vmem:[%s1084_s3 + $0x60] ss:$8 sps:$4 sm:$0xff]   ;;  %v756_v33 = vld [vmem:[%s1084_s3 + $0x74] ss:$8 sps:$4 sm:$0xff]   ;;  %v758_v34 = vld [vmem:[%s1084_s3 + $0x70] ss:$8 sps:$4 sm:$0xff]  }
   0xc   :  { %144 = vmatprep.subr.bf16.mxu0 %v720_v7  ;;  %v759_v35 = vld [vmem:[%s1084_s3 + $0x84] ss:$8 sps:$4 sm:$0xff]   ;;  %v761_v36 = vld [vmem:[%s1084_s3 + $0x80] ss:$8 sps:$4 sm:$0xff]  }
   0xe   :  { %392 = vmatpush1.bf16.msra.mxu1 %v743_v18 }
   0xf   :  { %145 = vmatpush1.bf16.msra.mxu0 %v722_v8  ;;  %393 = vmatprep.subr.bf16.mxu1 %v744_v19 }
  0x10   :  { %146 = vmatprep.subr.bf16.mxu0 %v723_v9 }
  0x12   :  { %394 = vmatpush1.bf16.msra.mxu1 %v746_v22 }
  0x13   :  { %147 = vmatpush1.bf16.msra.mxu0 %v725_v13  ;;  %395 = vmatprep.subr.bf16.mxu1 %v747_v23 }
  0x14   :  { %148 = vmatprep.subr.bf16.mxu0 %v726_v16 }
  0x16   :  { %396 = vmatpush1.bf16.msra.mxu1 %v749_v27 }
  0x17   :  { %149 = vmatpush1.bf16.msra.mxu0 %v728_v17  ;;  %397 = vmatprep.subr.bf16.mxu1 %v750_v28 }
  0x18   :  { %150 = vmatprep.subr.bf16.mxu0 %v729_v20 }
  0x1a   :  { %398 = vmatpush1.bf16.msra.mxu1 %v752_v29 }
  0x1b   :  { %151 = vmatpush1.bf16.msra.mxu0 %v731_v21  ;;  %399 = vmatprep.subr.bf16.mxu1 %v753_v30 }
  0x1c   :  { %152 = vmatprep.subr.bf16.mxu0 %v732_v24 }
  0x1e   :  { %400 = vmatpush1.bf16.msra.mxu1 %v755_v32 }
  0x1f   :  { %153 = vmatpush1.bf16.msra.mxu0 %v734_v25  ;;  %401 = vmatprep.subr.bf16.mxu1 %v756_v33 }
  0x22   :  { %171 = vmatmul.mubr.bf16.vlgmr.msra.gmra.mrb[0].mxu0 %v29_v31  ;;  %402 = vmatpush1.bf16.msra.mxu1 %v758_v34 }
  0x23   :  { %12 = vsyncpa [#allocation3], 0  ;;  %403 = vmatprep.subr.bf16.mxu1 %v759_v35  ;;  %v762_v37 = vld [vmem:[%s1084_s3 + $0x94] ss:$8 sps:$4 sm:$0xff]   ;;  %v764_v38 = vld [vmem:[%s1084_s3 + $0x90] ss:$8 sps:$4 sm:$0xff]   ;;  %v48_v63 = vlaneseq }
  0x24   :  { %v765_v39 = vld [vmem:[%s1084_s3 + $0xa4] ss:$8 sps:$4 sm:$0xff]   ;;  %v767_v40 = vld [vmem:[%s1084_s3 + $0xa0] ss:$8 sps:$4 sm:$0xff]   ;;  %v768_v41 = vld [vmem:[%s1084_s3 + $0xb4] ss:$8 sps:$4 sm:$0xff]  }
  0x25   :  { %v770_v42 = vld [vmem:[%s1084_s3 + $0xb0] ss:$8 sps:$4 sm:$0xff]   ;;  %v771_v43 = vld [vmem:[%s1084_s3 + $0xc4] ss:$8 sps:$4 sm:$0xff]   ;;  %v773_v44 = vld [vmem:[%s1084_s3 + $0xc0] ss:$8 sps:$4 sm:$0xff]  }
  0x26   :  { %404 = vmatpush1.bf16.msra.mxu1 %v761_v36  ;;  %v774_v45 = vld [vmem:[%s1084_s3 + $0xd4] ss:$8 sps:$4 sm:$0xff]   ;;  %v776_v46 = vld [vmem:[%s1084_s3 + $0xd0] ss:$8 sps:$4 sm:$0xff]   ;;  %v777_v47 = vld [vmem:[%s1084_s3 + $0xe4] ss:$8 sps:$4 sm:$0xff]  }
  0x27   :  { %405 = vmatprep.subr.bf16.mxu1 %v762_v37  ;;  %v779_v48 = vld [vmem:[%s1084_s3 + $0xe0] ss:$8 sps:$4 sm:$0xff]   ;;  %v780_v49 = vld [vmem:[%s1084_s3 + $0xf4] ss:$8 sps:$4 sm:$0xff]   ;;  %v782_v50 = vld [vmem:[%s1084_s3 + $0xf0] ss:$8 sps:$4 sm:$0xff]  }
  0x28   :  { %v783_v51 = vld [vmem:[%s1086_s5 + $0x40] sm:$0xff]   ;;  %v785_v53 = vld [vmem:[%s1086_s5 + $0x48] sm:$0xff]   ;;  %v787_v55 = vld [vmem:[%s1086_s5 + $0x50] sm:$0xff]   ;;  %v49_v0 = vshrl.u32 %v48_v63, 7 }
  0x29   :  { %v784_v52 = vld [vmem:[%s1086_s5] sm:$0xff]   ;;  %687 = vmatprep.subr.bf16.mxu0 %v783_v51  ;;  %v786_v54 = vld [vmem:[%s1086_s5 + $0x8] sm:$0xff]   ;;  %v788_v56 = vld [vmem:[%s1086_s5 + $0x10] sm:$0xff]  }
  0x2a   :  { %406 = vmatpush1.bf16.msra.mxu1 %v764_v38  ;;  %688 = vmatpush3.bf16.msra.mxu0 %v784_v52  ;;  %v789_v57 = vld [vmem:[%s1086_s5 + $0x58] sm:$0xff]   ;;  %v791_v59 = vld [vmem:[%s1086_s5 + $0x60] sm:$0xff]   ;;  %v793_v61 = vld [vmem:[%s1086_s5 + $0x68] sm:$0xff]   ;;  %v50_v1 = vsub.s32 0, %v49_v0  ;;  %v54_v3 = vsub.s32 1, %v49_v0 }
  0x2b   :  { %407 = vmatprep.subr.bf16.mxu1 %v765_v39  ;;  %689 = vmatprep.subr.bf16.mxu0 %v785_v53  ;;  %v790_v58 = vld [vmem:[%s1086_s5 + $0x18] sm:$0xff]   ;;  %v792_v60 = vld [vmem:[%s1086_s5 + $0x20] sm:$0xff]   ;;  %v794_v62 = vld [vmem:[%s1086_s5 + $0x28] sm:$0xff]  }
  0x2c   :  { %v46_v2 = vld [vmem:[%s1083_s2] sm:$0x3]  ;;  %v795_v16 = vld [vmem:[%s1086_s5 + $0x70] sm:$0xff]   ;;  %v797_v18 = vld [vmem:[%s1086_s5 + $0x78] sm:$0xff]  }
  0x2d   :  { %v51_v4 = vrot.slane %v46_v2, %v50_v1  ;;  %v55_v5 = vrot.slane %v46_v2, %v54_v3  ;;  %v796_v17 = vld [vmem:[%s1086_s5 + $0x30] sm:$0xff]   ;;  %v798_v19 = vld [vmem:[%s1086_s5 + $0x38] sm:$0xff]   ;;  %v215_v20 = vld [vmem:[%s1085_s4] sm:$0x3]  ;;  %s824_s4 = smov [#allocation2]  }
  0x2e   :  { %408 = vmatpush1.bf16.msra.mxu1 %v767_v40  ;;  %690 = vmatpush3.bf16.msra.mxu0 %v786_v54  ;;  %v220_v21 = vrot.slane %v215_v20, %v50_v1  ;;  %v224_v22 = vrot.slane %v215_v20, %v54_v3  ;;  %v670_v35 = vld [vmem:[%s1087_s6] ss:$0 sm:$0xff]  ;;  %s614_s12 = sshll.u32 %s824_s4, 4  ;;  %s615_s12 = int_to_ptr.vmem [resolvable:$true] %s614_s12 }
  0x2f   :  { %409 = vmatprep.subr.bf16.mxu1 %v768_v41  ;;  %691 = vmatprep.subr.bf16.mxu0 %v787_v55  ;;  %s799_s1 = scalar_lea.vmem %s615_s12, 128  ;;  %p804_p1 = scmp.lt.s32.totalorder %s615_s12, %s615_s12 }
  0x30   :  { %p800_p0 = scmp.ne.s32.totalorder %s615_s12, %s799_s1  ;;  %p805_p2 = scmp.lt.s32.totalorder %s799_s1, %s799_s1 }
  0x32   :  { %410 = vmatpush1.bf16.msra.mxu1 %v770_v42  ;;  %692 = vmatpush3.bf16.msra.mxu0 %v788_v56  ;;  %p806_p3 = por %p805_p2, %p804_p1 }
  0x33   :  { %411 = vmatprep.subr.bf16.mxu1 %v771_v43  ;;  %693 = vmatprep.subr.bf16.mxu0 %v789_v57 }
  0x34   :  { %p807_p4 = pnand %p806_p3, %p800_p0 }
  0x36   :  { %412 = vmatpush1.bf16.msra.mxu1 %v773_v44  ;;  %694 = vmatpush3.bf16.msra.mxu0 %v790_v58 }
  0x37   :  { %413 = vmatprep.subr.bf16.mxu1 %v774_v45  ;;  %695 = vmatprep.subr.bf16.mxu0 %v791_v59 }
  0x3a   :  { %414 = vmatpush1.bf16.msra.mxu1 %v776_v46  ;;  %696 = vmatpush3.bf16.msra.mxu0 %v792_v60 }
  0x3b   :  { %415 = vmatprep.subr.bf16.mxu1 %v777_v47  ;;  %697 = vmatprep.subr.bf16.mxu0 %v793_v61 }
  0x3e   :  { %416 = vmatpush1.bf16.msra.mxu1 %v779_v48  ;;  %698 = vmatpush3.bf16.msra.mxu0 %v794_v62 }
  0x3f   :  { %417 = vmatprep.subr.bf16.mxu1 %v780_v49  ;;  %699 = vmatprep.subr.bf16.mxu0 %v795_v16 }
  0x42   :  { %418 = vmatpush1.bf16.msra.mxu1 %v782_v50  ;;  %700 = vmatpush3.bf16.msra.mxu0 %v796_v17 }
  0x43   :  { %701 = vmatprep.subr.bf16.mxu0 %v797_v18 }
  0x46   :  { %702 = vmatpush3.bf16.msra.mxu0 %v798_v19 }
  0xf5   :  { %v172_v6 = vpop.f32.mrb[0].mxu0 }
  0xf6   :  { %v173_v7 = vadd.f32 %v172_v6, %v51_v4  ;;  %v174_v8 = vpop.f32.mrb[1].mxu0 }
  0xf7   :  { %v175_v9 = vadd.f32 %v174_v8, %v55_v5  ;;  %v176_v10 = vpop.f32.mrb[2].mxu0 }
  0xf8   :  { %v179_v11 = vmax.f32 %v173_v7, 0.0  ;;  %v177_v12 = vpop.f32.mrb[3].mxu0 }
  0xf9   :  { %v180_v13 = vmax.f32 %v175_v9, 0.0 }
  0xfa   :  { %v181_v15 = vpack.c.bf16 %v179_v11, %v179_v11 }
  0xfb   :  { %v182_v14 = vpack.c.bf16 %v180_v13, %v180_v13 }
  0xfd   :  { %419 = vmatprep.mubr.bf16.mxu1 %v182_v14 }
  0xfe   :  { %420 = vmatmul.mubr.bf16.vlgmr.msra.gmra.mrb[0].mxu1 %v181_v15 }
 0x1d1   :  { %v421_v23 = vpop.f32.mrb[0].mxu1 }
 0x1d2   :  { %v422_v24 = vadd.f32 %v421_v23, %v220_v21  ;;  %v423_v25 = vpop.f32.mrb[1].mxu1 }
 0x1d3   :  { %v424_v26 = vadd.f32 %v423_v25, %v224_v22  ;;  %v425_v27 = vpop.f32.mrb[2].mxu1 }
 0x1d4   :  { %v428_v28 = vmax.f32 %v422_v24, 0.0  ;;  %v426_v29 = vpop.f32.mrb[3].mxu1 }
 0x1d5   :  { %v429_v30 = vmax.f32 %v424_v26, 0.0 }
 0x1d6   :  { %v430_v32 = vpack.c.bf16 %v428_v28, %v428_v28 }
 0x1d7   :  { %v431_v31 = vpack.c.bf16 %v429_v30, %v429_v30 }
 0x1d9   :  { %599 = vmatprep.mubr.bf16.mxu0 %v431_v31 }
 0x1da   :  { %600 = vmatmul.mubr.bf16.vlgmr.msra.gmra.mrb[4].mxu0 %v430_v32 }
 0x2ad   :  { %v703_v33 = vpop.f32.mrb[4].mxu0 }
 0x2ae   :  { %v704_v34 = vpop.f32.mrb[5].mxu0 }
 0x2af   :  { %v705_v36 = vadd.f32 %v704_v34, %v703_v33  ;;  %v706_v37 = vpop.f32.mrb[6].mxu0 }
 0x2b0   :  { %v707_v38 = vpop.f32.mrb[7].mxu0 }
 0x2b1   :  { %v602_v39 = vadd.f32 %v705_v36, %v670_v35 }
 0x2b3   :  { %607 = vst [vmem:[#allocation2] sm:$0xff] %v602_v39 }
 0x2b4   :  { %810 = shalt.err (!%p807_p4)
}
 0x2b5   :  { %s811_s14 = scalar_lea.hbm %s1088_s7, 128 }
 0x2b6   :  { %p812_p5 = scmp.ne.s32.totalorder %s1088_s7, %s811_s14  ;;  %p815_p6 = scmp.lt.u32.totalorder %s811_s14, %s1088_s7 }
 0x2b8   :  { %p817_p7 = pnand %p815_p6, %p812_p5 }
 0x2ba   :  { %820 = shalt.err (!%p817_p7)
}
 0x2bb   :  { %617 = dma.vmem_to_hbm [thread:$0]  %s615_s12, 128, %s1088_s7, [#allocation3]  }
 0x2bc   :  { %821 = dma.done.wait [#allocation3], 128  }
 0x2bd   :  { %822 = vsyncadd [#allocation3], 4294967168 }
 0x2be   :  { %621 = vsyncpa [#allocation3], 1 }

</bundles_post_ra>
